<compile_context>
chip_gen: v7x
topology: tpu7x:2x2x1
jax: 0.10.0
libtpu: 0.0.40
codegen_flags: <defaults>
</compile_context>

<pallas_src>
import math

import jax
import jax.numpy as jnp
from jax.experimental import pallas as pl
from jax.experimental.pallas import tpu as pltpu


def _round_up(x, m):
    return ((x + m - 1) // m) * m


# ------------- exact GELU (erf) without relying on a lax.erf lowering --------
# Abramowitz & Stegun 7.1.26 rational approximation of erf (max abs error
# ~1.5e-7), i.e. numerically indistinguishable in f32 from PyTorch's exact
# nn.GELU().  The reciprocal uses the EUP approximate vrcp plus one
# Newton-Raphson refinement step, so no full-precision divide lands on the
# VALU slots (which are the binding unit for small dim).
_ERF_P = 0.3275911
_ERF_A1 = 0.254829592
_ERF_A2 = -0.284496736
_ERF_A3 = 1.421413741
_ERF_A4 = -1.453152027
_ERF_A5 = 1.061405429
_INV_SQRT2 = 0.7071067811865476


def _erf(z):
    s = jnp.where(z >= 0.0, 1.0, -1.0)
    a = jnp.abs(z)
    d = 1.0 + _ERF_P * a
    t = pl.reciprocal(d, approx=True)      # EUP slot (otherwise idle)
    t = t * (2.0 - d * t)                  # one NR step -> ~full f32 accuracy
    poly = t * (_ERF_A1 + t * (_ERF_A2 + t * (_ERF_A3 + t * (_ERF_A4 + t * _ERF_A5))))
    return s * (1.0 - poly * jnp.exp(-a * a))


def _gelu_exact(x):
    return 0.5 * x * (1.0 + _erf(x * _INV_SQRT2))


# --------------------------------- kernel ------------------------------------
def _ffn_kernel(x_ref, w1_ref, b1_ref, w2_ref, b2_ref, o_ref, acc_ref):
    """One grid step = (one M tile) x (one hidden tile).

    x_ref:   (bm, dim)       activation tile
    w1_ref:  (dim, bh)       first-layer weight tile  (column slice of hidden)
    b1_ref:  (1, bh)         first-layer bias tile
    w2_ref:  (bh, dim)       second-layer weight tile (row slice of hidden)
    b2_ref:  (1, dim)        second-layer bias
    o_ref:   (bm, dim)       output tile (resident across the hidden axis)
    acc_ref: (bm, dim) f32   accumulator scratch
    """
    h_idx = pl.program_id(1)

    @pl.when(h_idx == 0)
    def _init():
        acc_ref[...] = jnp.zeros_like(acc_ref)

    # Linear1 (MXU, f32 accumulate) + bias + exact GELU on this hidden slice.
    h = jnp.dot(x_ref[...], w1_ref[...], preferred_element_type=jnp.float32)
    h = _gelu_exact(h + b1_ref[...].astype(jnp.float32))

    # Linear2 partial product accumulated into the resident f32 scratch.
    # (h is rounded to the weight dtype; intentional mixed precision when the
    #  caller supplies bf16 weights.)
    acc_ref[...] += jnp.dot(h.astype(w2_ref.dtype), w2_ref[...],
                            preferred_element_type=jnp.float32)

    @pl.when(h_idx == pl.num_programs(1) - 1)
    def _finalize():
        o_ref[...] = (acc_ref[...] + b2_ref[...].astype(jnp.float32)).astype(o_ref.dtype)


# ----------------------------- parameter prep --------------------------------
def prepare_ffn_params(w1, b1, w2, b2, *, compute_dtype=None):
    """One-time conversion of PyTorch-layout Linear weights to kernel layout.

    w1: (hidden, dim)  b1: (hidden,)  w2: (dim, hidden)  b2: (dim,)
    Returns (w1_k, b1_k, w2_k, b2_k) with the contraction dim on sublanes and
    the output dim on lanes; hidden is zero-padded to a multiple of 128 (safe:
    GELU(0)=0 and the padded w2 rows are zero).  Call once and reuse so the
    transpose / pad / dtype cast never sits on the per-call hot path.
    Pass compute_dtype=jnp.bfloat16 to halve HBM weight traffic (accumulation
    stays f32 inside the kernel).
    """
    hidden, dim = w1.shape
    assert w2.shape == (dim, hidden)
    assert b1.shape == (hidden,) and b2.shape == (dim,)

    if compute_dtype is not None:
        w1 = w1.astype(compute_dtype)
        w2 = w2.astype(compute_dtype)

    hidden_pad = _round_up(hidden, 128)
    w1_k = jnp.transpose(w1)                       # (dim, hidden)
    w2_k = jnp.transpose(w2)                       # (hidden, dim)
    b1_k = b1.astype(jnp.float32).reshape(1, hidden)
    b2_k = b2.astype(jnp.float32).reshape(1, dim)
    if hidden_pad != hidden:
        w1_k = jnp.pad(w1_k, ((0, 0), (0, hidden_pad - hidden)))
        w2_k = jnp.pad(w2_k, ((0, hidden_pad - hidden), (0, 0)))
        b1_k = jnp.pad(b1_k, ((0, 0), (0, hidden_pad - hidden)))
    return w1_k, b1_k, w2_k, b2_k


# ----------------------------- tiling heuristics ------------------------------
def _vmem_estimate(bm, dim, bh, x_it, w_it, out_it):
    """Double-buffered inputs/outputs + f32 accumulator scratch, in bytes."""
    return (2 * bm * dim * x_it          # x tiles
            + 2 * dim * bh * w_it        # w1 tiles
            + 2 * 8 * bh * 4             # b1 (sublane-padded, f32)
            + 2 * bh * dim * w_it        # w2 tiles
            + 2 * 8 * dim * 4            # b2
            + 2 * bm * dim * out_it      # output tiles
            + bm * dim * 4)              # accumulator scratch


def _bh_candidates(hidden_pad, block_h):
    """Multiples of 128 that divide hidden_pad, descending, capped by block_h."""
    cap = max(128, min(_round_up(block_h, 128), hidden_pad))
    cands = [v for v in range(cap, 127, -128) if hidden_pad % v == 0]
    if not cands:
        cands = [hidden_pad]
    return cands


# -------------------------------- wrapper ------------------------------------
def feed_forward(x, w1_k, b1_k, w2_k, b2_k, *, dropout=0.0,
                 block_m=1024, block_h=512, allow_resident_weights=True,
                 compute_dtype=None, interpret=False):
    """FeedForward forward pass. Takes kernel-layout params from
    prepare_ffn_params(). Eval-mode only (dropout must be 0.0)."""
    # TODO(synk): training-mode dropout (p > 0) not implemented.
    assert dropout == 0.0, "only inference (dropout == 0.0) is supported"

    *lead, dim = x.shape
    dim_w, hidden_pad = w1_k.shape
    assert dim_w == dim and w2_k.shape == (hidden_pad, dim)
    assert b1_k.shape == (1, hidden_pad) and b2_k.shape == (1, dim)

    out_dtype = x.dtype
    M = int(math.prod(lead)) if lead else 1
    x2 = x.reshape(M, dim)
    if compute_dtype is not None:
        x2 = x2.astype(compute_dtype)

    x_it = x2.dtype.itemsize
    w_it = w1_k.dtype.itemsize
    out_it = jnp.dtype(out_dtype).itemsize

    # ---- VMEM budget from the actual chip (128 MiB v5e/v6e, 64 MiB v7x) ----
    try:
        vmem_cap = int(pltpu.get_tpu_info().vmem_capacity_bytes)
    except Exception:
        vmem_cap = 64 * 1024 * 1024           # conservative fallback (v7x)
    budget = int(vmem_cap * 0.8)              # headroom for compiler scratch

    # ---- row (M) tiling: multiple-of-8 sublanes, "parallel" axis ------------
    bm = max(8, _round_up(min(block_m, _round_up(M, 8)), 8))
    # v7x shards the "parallel" axis across 2 TensorCores: if one tile would
    # cover a large M, split it in two so no core idles (cheap on 1-TC chips).
    if bm >= _round_up(M, 8) and M >= 2048:
        bm = _round_up((M + 1) // 2, 8)

    # ---- hidden tiling: keep both weight matrices resident when they fit ----
    bh = None
    if allow_resident_weights and \
            _vmem_estimate(bm, dim, hidden_pad, x_it, w_it, out_it) <= budget:
        bh = hidden_pad                        # n_h == 1 -> weights DMA'd once
    if bh is None:
        cands = _bh_candidates(hidden_pad, block_h)
        while True:
            for c in cands:                    # shrink bh first ...
                if _vmem_estimate(bm, dim, c, x_it, w_it, out_it) <= budget:
                    bh = c
                    break
            if bh is not None or bm <= 8:
                break
            bm = max(8, _round_up(bm // 2, 8))  # ... then bm as a last resort
        if bh is None:
            bh = cands[-1]

    m_pad = _round_up(M, bm)
    if m_pad != M:
        x2 = jnp.pad(x2, ((0, m_pad - M), (0, 0)))
    n_m = m_pad // bm
    n_h = hidden_pad // bh

    vmem_est = _vmem_estimate(bm, dim, bh, x_it, w_it, out_it)
    vmem_limit = int(min(budget, max(32 * 1024 * 1024, vmem_est + (4 << 20))))

    # Weights are fetched once if resident (n_h == 1), else once per M tile.
    weight_passes = 1 if n_h == 1 else n_m
    w_bytes = (w1_k.size * w_it + w2_k.size * w_it
               + b1_k.size * b1_k.dtype.itemsize + b2_k.size * b2_k.dtype.itemsize)
    cost = pl.CostEstimate(
        flops=4 * m_pad * dim * hidden_pad,
        transcendentals=2 * m_pad * hidden_pad,     # exp + reciprocal in GELU
        bytes_accessed=(m_pad * dim * x_it + m_pad * dim * out_it
                        + weight_passes * w_bytes),
    )

    out2 = pl.pallas_call(
        _ffn_kernel,
        out_shape=jax.ShapeDtypeStruct((m_pad, dim), out_dtype),
        grid_spec=pltpu.PrefetchScalarGridSpec(
            num_scalar_prefetch=0,
            grid=(n_m, n_h),
            in_specs=[
                pl.BlockSpec((bm, dim), lambda m, h: (m, 0)),
                pl.BlockSpec((dim, bh), lambda m, h: (0, h)),
                pl.BlockSpec((1, bh), lambda m, h: (0, h)),
                pl.BlockSpec((bh, dim), lambda m, h: (h, 0)),
                pl.BlockSpec((1, dim), lambda m, h: (0, 0)),
            ],
            out_specs=pl.BlockSpec((bm, dim), lambda m, h: (m, 0)),
            scratch_shapes=[pltpu.VMEM((bm, dim), jnp.float32)],
        ),
        compiler_params=pltpu.CompilerParams(
            dimension_semantics=("parallel", "arbitrary"),
            vmem_limit_bytes=vmem_limit),
        cost_estimate=cost,
        interpret=interpret,
    )(x2, w1_k, b1_k, w2_k, b2_k)

    if m_pad != M:
        out2 = out2[:M]
    return out2.reshape(x.shape)


# ------------------------------- reference -----------------------------------
def _reference(x, w1, b1, w2, b2):
    h = jnp.dot(x, w1.T, precision=jax.lax.Precision.HIGHEST) + b1
    h = jax.nn.gelu(h, approximate=False)          # exact GELU, like nn.GELU()
    return jnp.dot(h, w2.T, precision=jax.lax.Precision.HIGHEST) + b2


if __name__ == "__main__":
    # Small but lane-dense shapes: batch=2, seq=8, dim=128, hidden_dim=256.
    B, S, DIM, HID = 2, 8, 128, 256

    key = jax.random.PRNGKey(0)
    kx, kw1, kb1, kw2, kb2 = jax.random.split(key, 5)
    x = jax.random.normal(kx, (B, S, DIM), dtype=jnp.float32)
    w1 = jax.random.normal(kw1, (HID, DIM), dtype=jnp.float32) / math.sqrt(DIM)
    b1 = 0.1 * jax.random.normal(kb1, (HID,), dtype=jnp.float32)
    w2 = jax.random.normal(kw2, (DIM, HID), dtype=jnp.float32) / math.sqrt(HID)
    b2 = 0.1 * jax.random.normal(kb2, (DIM,), dtype=jnp.float32)

    # One-time layout prep (transpose / pad hoisted off the per-call hot path).
    params = prepare_ffn_params(w1, b1, w2, b2)
    ref = _reference(x, w1, b1, w2, b2)

    # Path 1: default tiling -> weights fully resident in VMEM (n_h == 1).
    out_resident = jax.block_until_ready(feed_forward(x, *params))

    # Path 2: forced hidden tiling -> exercises the reduction-accumulator path.
    out_tiled = jax.block_until_ready(
        feed_forward(x, *params, block_h=128, allow_resident_weights=False))

    for out in (out_resident, out_tiled):
        assert out.shape == x.shape
        err = float(jnp.max(jnp.abs(out - ref)))
        assert jnp.allclose(out, ref, atol=5e-4, rtol=5e-4), (
            f"mismatch vs reference, max abs err = {err}")

    print("KERNEL_OK")
</pallas_src>

<mosaic_0001>
module attributes {stable_mosaic.version = 11 : i64} {
  func.func @_ffn_kernel(%arg0: i32, %arg1: i32, %arg2: memref<16x128xf32, #tpu.memory_space<vmem>>, %arg3: memref<128x256xf32, #tpu.memory_space<vmem>>, %arg4: memref<1x256xf32, #tpu.memory_space<vmem>>, %arg5: memref<256x128xf32, #tpu.memory_space<vmem>>, %arg6: memref<1x128xf32, #tpu.memory_space<vmem>>, %arg7: memref<16x128xf32, #tpu.memory_space<vmem>>, %arg8: memref<16x128xf32, #tpu.memory_space<vmem>>) attributes {dimension_semantics = [#tpu.dimension_semantics<parallel>, #tpu.dimension_semantics<arbitrary>], iteration_bounds = array<i64: 1, 1>, scalar_prefetch = 0 : i64, scratch_operands = 1 : i64, tpu.core_type = #tpu.core_type<tc>, window_params = [{transform_indices = @transform_0, window_bounds = array<i64: 16, 128>}, {transform_indices = @transform_1, window_bounds = array<i64: 128, 256>}, {transform_indices = @transform_2, window_bounds = array<i64: 1, 256>}, {transform_indices = @transform_3, window_bounds = array<i64: 256, 128>}, {pipeline_mode = #tpu.pipeline_mode<synchronous>, transform_indices = @transform_4, window_bounds = array<i64: 1, 128>}, {transform_indices = @transform_5, window_bounds = array<i64: 16, 128>}]} {
    %c0_i32 = arith.constant 0 : i32
    %0 = arith.cmpi eq, %arg1, %c0_i32 : i32
    %1 = arith.extui %0 : i1 to i32
    %c0_i32_0 = arith.constant 0 : i32
    %2 = arith.cmpi ne, %1, %c0_i32_0 : i32
    scf.if %2 {
      %cst_31 = arith.constant 0.000000e+00 : f32
      %61 = vector.broadcast %cst_31 : f32 to vector<16x128xf32>
      %c0_32 = arith.constant 0 : index
      %c0_33 = arith.constant 0 : index
      %62 = vector.load %arg8[%c0_32, %c0_33] : memref<16x128xf32, #tpu.memory_space<vmem>>, vector<16x128xf32>
      tpu.vector_store %arg8[%c0_32, %c0_33], %61 {strides = array<i32>} : memref<16x128xf32, #tpu.memory_space<vmem>>, vector<16x128xf32>,
    } else {
    }
    %c0 = arith.constant 0 : index
    %c0_1 = arith.constant 0 : index
    %3 = vector.load %arg2[%c0, %c0_1] : memref<16x128xf32, #tpu.memory_space<vmem>>, vector<16x128xf32>
    %c0_2 = arith.constant 0 : index
    %c0_3 = arith.constant 0 : index
    %4 = vector.load %arg3[%c0_2, %c0_3] : memref<128x256xf32, #tpu.memory_space<vmem>>, vector<128x256xf32>
    %cst = arith.constant dense<0.000000e+00> : vector<16x256xf32>
    %5 = tpu.matmul %3, %4, %cst {dimension_numbers = #tpu.dot_dimension_numbers<[1], [0], [0], [1], [0, 0, 1, 1], [], []>} : vector<16x128xf32>, vector<128x256xf32>, vector<16x256xf32> -> vector<16x256xf32>
    %c0_4 = arith.constant 0 : index
    %c0_5 = arith.constant 0 : index
    %6 = vector.load %arg4[%c0_4, %c0_5] : memref<1x256xf32, #tpu.memory_space<vmem>>, vector<1x256xf32>
    %7 = vector.broadcast %6 : vector<1x256xf32> to vector<16x256xf32>
    %8 = arith.addf %5, %7 : vector<16x256xf32>
    %cst_6 = arith.constant 5.000000e-01 : f32
    %9 = vector.broadcast %cst_6 : f32 to vector<16x256xf32>
    %10 = arith.mulf %9, %8 : vector<16x256xf32>
    %cst_7 = arith.constant 0.707106769 : f32
    %11 = vector.broadcast %cst_7 : f32 to vector<16x256xf32>
    %12 = arith.mulf %8, %11 : vector<16x256xf32>
    %cst_8 = arith.constant 0.000000e+00 : f32
    %13 = vector.broadcast %cst_8 : f32 to vector<16x256xf32>
    %14 = arith.cmpf oge, %12, %13 : vector<16x256xf32>
    %cst_9 = arith.constant 1.000000e+00 : f32
    %cst_10 = arith.constant -1.000000e+00 : f32
    %15 = vector.broadcast %cst_9 : f32 to vector<16x256xf32>
    %16 = vector.broadcast %cst_10 : f32 to vector<16x256xf32>
    %17 = arith.select %14, %15, %16 : vector<16x256xi1>, vector<16x256xf32>
    %18 = math.absf %12 : vector<16x256xf32>
    %cst_11 = arith.constant 0.327591091 : f32
    %19 = vector.broadcast %cst_11 : f32 to vector<16x256xf32>
    %20 = arith.mulf %19, %18 : vector<16x256xf32>
    %cst_12 = arith.constant 1.000000e+00 : f32
    %21 = vector.broadcast %cst_12 : f32 to vector<16x256xf32>
    %22 = arith.addf %21, %20 : vector<16x256xf32>
    %23 = tpu.reciprocal %22 {approx = true} : vector<16x256xf32> -> vector<16x256xf32>
    %24 = arith.mulf %22, %23 : vector<16x256xf32>
    %cst_13 = arith.constant 2.000000e+00 : f32
    %25 = vector.broadcast %cst_13 : f32 to vector<16x256xf32>
    %26 = arith.subf %25, %24 : vector<16x256xf32>
    %27 = arith.mulf %23, %26 : vector<16x256xf32>
    %cst_14 = arith.constant 1.06140542 : f32
    %28 = vector.broadcast %cst_14 : f32 to vector<16x256xf32>
    %29 = arith.mulf %27, %28 : vector<16x256xf32>
    %cst_15 = arith.constant -1.45315206 : f32
    %30 = vector.broadcast %cst_15 : f32 to vector<16x256xf32>
    %31 = arith.addf %30, %29 : vector<16x256xf32>
    %32 = arith.mulf %27, %31 : vector<16x256xf32>
    %cst_16 = arith.constant 1.42141378 : f32
    %33 = vector.broadcast %cst_16 : f32 to vector<16x256xf32>
    %34 = arith.addf %33, %32 : vector<16x256xf32>
    %35 = arith.mulf %27, %34 : vector<16x256xf32>
    %cst_17 = arith.constant -0.284496725 : f32
    %36 = vector.broadcast %cst_17 : f32 to vector<16x256xf32>
    %37 = arith.addf %36, %35 : vector<16x256xf32>
    %38 = arith.mulf %27, %37 : vector<16x256xf32>
    %cst_18 = arith.constant 0.254829586 : f32
    %39 = vector.broadcast %cst_18 : f32 to vector<16x256xf32>
    %40 = arith.addf %39, %38 : vector<16x256xf32>
    %41 = arith.mulf %27, %40 : vector<16x256xf32>
    %cst_19 = arith.constant 0.000000e+00 : f32
    %42 = vector.broadcast %cst_19 : f32 to vector<16x256xf32>
    %43 = arith.subf %42, %18 : vector<16x256xf32>
    %44 = arith.mulf %43, %18 : vector<16x256xf32>
    %45 = math.exp %44 : vector<16x256xf32>
    %46 = arith.mulf %41, %45 : vector<16x256xf32>
    %cst_20 = arith.constant 1.000000e+00 : f32
    %47 = vector.broadcast %cst_20 : f32 to vector<16x256xf32>
    %48 = arith.subf %47, %46 : vector<16x256xf32>
    %49 = arith.mulf %17, %48 : vector<16x256xf32>
    %cst_21 = arith.constant 1.000000e+00 : f32
    %50 = vector.broadcast %cst_21 : f32 to vector<16x256xf32>
    %51 = arith.addf %50, %49 : vector<16x256xf32>
    %52 = arith.mulf %10, %51 : vector<16x256xf32>
    %c0_22 = arith.constant 0 : index
    %c0_23 = arith.constant 0 : index
    %53 = vector.load %arg8[%c0_22, %c0_23] : memref<16x128xf32, #tpu.memory_space<vmem>>, vector<16x128xf32>
    %c0_24 = arith.constant 0 : index
    %c0_25 = arith.constant 0 : index
    %54 = vector.load %arg5[%c0_24, %c0_25] : memref<256x128xf32, #tpu.memory_space<vmem>>, vector<256x128xf32>
    %cst_26 = arith.constant dense<0.000000e+00> : vector<16x128xf32>
    %55 = tpu.matmul %52, %54, %cst_26 {dimension_numbers = #tpu.dot_dimension_numbers<[1], [0], [0], [1], [0, 0, 1, 1], [], []>} : vector<16x256xf32>, vector<256x128xf32>, vector<16x128xf32> -> vector<16x128xf32>
    %56 = arith.addf %53, %55 : vector<16x128xf32>
    %c0_27 = arith.constant 0 : index
    %c0_28 = arith.constant 0 : index
    %57 = vector.load %arg8[%c0_27, %c0_28] : memref<16x128xf32, #tpu.memory_space<vmem>>, vector<16x128xf32>
    tpu.vector_store %arg8[%c0_27, %c0_28], %56 {strides = array<i32>} : memref<16x128xf32, #tpu.memory_space<vmem>>, vector<16x128xf32>,
    %c0_i32_29 = arith.constant 0 : i32
    %58 = arith.cmpi eq, %arg1, %c0_i32_29 : i32
    %59 = arith.extui %58 : i1 to i32
    %c0_i32_30 = arith.constant 0 : i32
    %60 = arith.cmpi ne, %59, %c0_i32_30 : i32
    scf.if %60 {
      %c0_31 = arith.constant 0 : index
      %c0_32 = arith.constant 0 : index
      %61 = vector.load %arg8[%c0_31, %c0_32] : memref<16x128xf32, #tpu.memory_space<vmem>>, vector<16x128xf32>
      %c0_33 = arith.constant 0 : index
      %c0_34 = arith.constant 0 : index
      %62 = vector.load %arg6[%c0_33, %c0_34] : memref<1x128xf32, #tpu.memory_space<vmem>>, vector<1x128xf32>
      %63 = vector.broadcast %62 : vector<1x128xf32> to vector<16x128xf32>
      %64 = arith.addf %61, %63 : vector<16x128xf32>
      %c0_35 = arith.constant 0 : index
      %c0_36 = arith.constant 0 : index
      %65 = vector.load %arg7[%c0_35, %c0_36] : memref<16x128xf32, #tpu.memory_space<vmem>>, vector<16x128xf32>
      tpu.vector_store %arg7[%c0_35, %c0_36], %64 {strides = array<i32>} : memref<16x128xf32, #tpu.memory_space<vmem>>, vector<16x128xf32>,
    } else {
    }
    return
  }
  func.func @transform_0(%arg0: i32, %arg1: i32) -> (i32, i32) {
    %c0_i32 = arith.constant 0 : i32
    %c0_i32_0 = arith.constant 0 : i32
    return %arg0, %c0_i32 : i32, i32
  }
  func.func @transform_1(%arg0: i32, %arg1: i32) -> (i32, i32) {
    %c0_i32 = arith.constant 0 : i32
    %c0_i32_0 = arith.constant 0 : i32
    return %c0_i32, %arg1 : i32, i32
  }
  func.func @transform_2(%arg0: i32, %arg1: i32) -> (i32, i32) {
    %c0_i32 = arith.constant 0 : i32
    %c0_i32_0 = arith.constant 0 : i32
    return %c0_i32, %arg1 : i32, i32
  }
  func.func @transform_3(%arg0: i32, %arg1: i32) -> (i32, i32) {
    %c0_i32 = arith.constant 0 : i32
    %c0_i32_0 = arith.constant 0 : i32
    return %arg1, %c0_i32 : i32, i32
  }
  func.func @transform_4(%arg0: i32, %arg1: i32) -> (i32, i32) {
    %c0_i32 = arith.constant 0 : i32
    %c0_i32_0 = arith.constant 0 : i32
    %c0_i32_1 = arith.constant 0 : i32
    return %c0_i32, %c0_i32_0 : i32, i32
  }
  func.func @transform_5(%arg0: i32, %arg1: i32) -> (i32, i32) {
    %c0_i32 = arith.constant 0 : i32
    %c0_i32_0 = arith.constant 0 : i32
    return %arg0, %c0_i32 : i32, i32
  }
}

</mosaic_0001>

<bundles_post_ra>
// kernel: tpu_custom_call.1
= control target key start
LH: loop header
LB: loop body
LE: loop exit
PB: predicated region body
PF: predicated region fallthrough
CT: control target
= control target key end

     0   :  { %10 = vsyncpa [#allocation4], 0  ;;  %s814_s0 = inlined_call_operand.hbm [shape: f32[16,128], index: 0, kind: input, shape index: {}]   ;;  %s815_s1 = inlined_call_operand.hbm [shape: f32[128,256], index: 1, kind: input, shape index: {}]   ;;  %s816_s2 = inlined_call_operand.vmem [shape: f32[1,256], index: 2, kind: input, shape index: {}]   ;;  %s817_s3 = inlined_call_operand.hbm [shape: f32[256,128], index: 3, kind: input, shape index: {}]   ;;  %s818_s4 = inlined_call_operand.vmem [shape: f32[1,128], index: 4, kind: input, shape index: {}]   ;;  %s819_s5 = inlined_call_operand.hbm [shape: f32[16,128], index: 5, kind: output, shape index: {}]  }
   0x1   :  { %11 = vsyncpa [#allocation7], 0 }
   0x2   :  { %12 = vsyncpa [#allocation5], 0  ;;  %s677_s18 = smov [#allocation6]   ;;  %s583_s22 = scalar_lea.hbm %s815_s1, 4096 }
   0x3   :  { %s30_s19 = sshll.u32 %s677_s18, 4  ;;  %p584_p0 = scmp.ne.s32.totalorder %s815_s1, %s583_s22  ;;  %s31_s19 = int_to_ptr.vmem [resolvable:$true] %s30_s19 }
   0x4   :  { %p587_p1 = scmp.lt.u32.totalorder %s583_s22, %s815_s1 }
   0x6   :  { %p589_p2 = pnand %p587_p1, %p584_p0 }
   0x8   :  { %592 = shalt.err (!%p589_p2)
}
   0x9   :  { %s593_s27 = scalar_lea.vmem %s31_s19, 4096  ;;  %p598_p4 = scmp.lt.s32.totalorder %s31_s19, %s31_s19 }
   0xa   :  { %p594_p3 = scmp.ne.s32.totalorder %s31_s19, %s593_s27  ;;  %p599_p5 = scmp.lt.s32.totalorder %s593_s27, %s593_s27 }
   0xc   :  { %p600_p6 = por %p599_p5, %p598_p4 }
   0xe   :  { %p601_p7 = pnand %p600_p6, %p594_p3 }
  0x10   :  { %604 = shalt.err (!%p601_p7)
}
  0x11   :  { %s678_s28 = smov 256   ;;  %s679_s29 = smov 16  }
  0x12   :  { %36 = dma.hbm_to_vmem [thread:$0]  %s815_s1, 4096, %s31_s19, [#allocation7], %s678_s28, %s678_s28, %s679_s29  }
  0x13   :  { %s680_s7 = smov [#allocation3]   ;;  %s605_s11 = scalar_lea.hbm %s814_s0, 256 }
  0x14   :  { %s18_s8 = sshll.u32 %s680_s7, 4  ;;  %p606_p8 = scmp.ne.s32.totalorder %s814_s0, %s605_s11  ;;  %s19_s8 = int_to_ptr.vmem [resolvable:$true] %s18_s8 }
  0x15   :  { %p609_p9 = scmp.lt.u32.totalorder %s605_s11, %s814_s0 }
  0x17   :  { %p611_p10 = pnand %p609_p9, %p606_p8 }
  0x19   :  { %614 = shalt.err (!%p611_p10)
}
  0x1a   :  { %s615_s16 = scalar_lea.vmem %s19_s8, 256  ;;  %p620_p12 = scmp.lt.s32.totalorder %s19_s8, %s19_s8 }
  0x1b   :  { %p616_p11 = scmp.ne.s32.totalorder %s19_s8, %s615_s16  ;;  %p621_p13 = scmp.lt.s32.totalorder %s615_s16, %s615_s16 }
  0x1d   :  { %p622_p0 = por %p621_p13, %p620_p12 }
  0x1f   :  { %p623_p1 = pnand %p622_p0, %p616_p11 }
  0x21   :  { %626 = shalt.err (!%p623_p1)
}
  0x22   :  { %s681_s1 = smov 128   ;;  %s682_s17 = smov 8  }
  0x23   :  { %24 = dma.hbm_to_vmem [thread:$0]  %s814_s0, 256, %s19_s8, [#allocation4], %s681_s1, %s681_s1, %s682_s17  }
  0x24   :  { %s683_s20 = smov [#allocation8]   ;;  %s627_s24 = scalar_lea.hbm %s817_s3, 4096 }
  0x25   :  { %s44_s21 = sshll.u32 %s683_s20, 4  ;;  %p628_p2 = scmp.ne.s32.totalorder %s817_s3, %s627_s24  ;;  %s45_s21 = int_to_ptr.vmem [resolvable:$true] %s44_s21 }
  0x26   :  { %p631_p3 = scmp.lt.u32.totalorder %s627_s24, %s817_s3 }
  0x28   :  { %p633_p4 = pnand %p631_p3, %p628_p2 }
  0x2a   :  { %636 = shalt.err (!%p633_p4)
}
  0x2b   :  { %s637_s29 = scalar_lea.vmem %s45_s21, 4096  ;;  %p642_p6 = scmp.lt.s32.totalorder %s45_s21, %s45_s21 }
  0x2c   :  { %p638_p5 = scmp.ne.s32.totalorder %s45_s21, %s637_s29  ;;  %p643_p7 = scmp.lt.s32.totalorder %s637_s29, %s637_s29 }
  0x2e   :  { %p644_p8 = por %p643_p7, %p642_p6 }
  0x30   :  { %p645_p9 = pnand %p644_p8, %p638_p5 }
  0x32   :  { %648 = shalt.err (!%p645_p9)
}
  0x33   :  { %50 = dma.hbm_to_vmem [thread:$0]  %s817_s3, 4096, %s45_s21, [#allocation7], %s681_s1, %s681_s1, %s682_s17  }
  0x34   :  { %671 = dma.done.wait [#allocation4], 256  }
  0x35   :  { %672 = vsyncadd [#allocation4], 4294967040 }
  0x36   :  { %673 = dma.done.wait [#allocation7], 8192  }
  0x37   :  { %674 = vsyncadd [#allocation7], 4294959104  ;;  %v684_v0 = vmov 0.0   ;;  %v71_v1 = vld [vmem:[#allocation6 + $0x8] sm:$0xff]  ;;  %v73_v2 = vld [vmem:[#allocation6 + $0x18] sm:$0xff]  ;;  %s686_s8 = smov [#allocation9]  }
  0x38   :  { %178 = vmatprep.mubr.f32.mxu0 %v684_v0  ;;  %v70_v3 = vld [vmem:[#allocation6] sm:$0xff]  ;;  %v493_v4 = vpack.c.bf16 %v73_v2, %v71_v1  ;;  %v72_v5 = vld [vmem:[#allocation6 + $0x10] sm:$0xff]  ;;  %v75_v6 = vld [vmem:[#allocation6 + $0x28] sm:$0xff]  ;;  %s441_s9 = sshll.u32 %s686_s8, 4  ;;  %s442_s9 = int_to_ptr.vmem [resolvable:$true] %s441_s9 }
  0x39   :  { %v77_v7 = vld [vmem:[#allocation6 + $0x38] sm:$0xff]  ;;  %v495_v8 = vpack.c.bf16 %v72_v5, %v70_v3  ;;  %v74_v10 = vld [vmem:[#allocation6 + $0x20] sm:$0xff]  ;;  %v76_v11 = vld [vmem:[#allocation6 + $0x30] sm:$0xff]  ;;  %s649_s10 = scalar_lea.vmem %s442_s9, 256  ;;  %p654_p11 = scmp.lt.s32.totalorder %s442_s9, %s442_s9 }
  0x3a   :  { %v497_v9 = vpack.c.bf16 %v77_v7, %v75_v6  ;;  %v79_v12 = vld [vmem:[#allocation6 + $0x48] sm:$0xff]  ;;  %494 = vmatprep.subr.bf16.mxu0 %v493_v4  ;;  %v81_v13 = vld [vmem:[#allocation6 + $0x58] sm:$0xff]  ;;  %v499_v14 = vpack.c.bf16 %v76_v11, %v74_v10  ;;  %v78_v16 = vld [vmem:[#allocation6 + $0x40] sm:$0xff]  ;;  %p650_p10 = scmp.ne.s32.totalorder %s442_s9, %s649_s10  ;;  %p655_p12 = scmp.lt.s32.totalorder %s649_s10, %s649_s10 }
  0x3b   :  { %496 = vmatpush1.bf16.msra.mxu0 %v495_v8  ;;  %v501_v15 = vpack.c.bf16 %v81_v13, %v79_v12  ;;  %v80_v17 = vld [vmem:[#allocation6 + $0x50] sm:$0xff]  ;;  %v83_v18 = vld [vmem:[#allocation6 + $0x68] sm:$0xff]  ;;  %v85_v19 = vld [vmem:[#allocation6 + $0x78] sm:$0xff] }
  0x3c   :  { %498 = vmatprep.subr.bf16.mxu0 %v497_v9  ;;  %v503_v20 = vpack.c.bf16 %v80_v17, %v78_v16  ;;  %v505_v21 = vpack.c.bf16 %v85_v19, %v83_v18  ;;  %v82_v22 = vld [vmem:[#allocation6 + $0x60] sm:$0xff]  ;;  %v84_v23 = vld [vmem:[#allocation6 + $0x70] sm:$0xff]  ;;  %v87_v24 = vld [vmem:[#allocation6 + $0x88] sm:$0xff]  ;;  %p656_p13 = por %p655_p12, %p654_p11 }
  0x3d   :  { %v89_v25 = vld [vmem:[#allocation6 + $0x98] sm:$0xff]  ;;  %v507_v26 = vpack.c.bf16 %v84_v23, %v82_v22  ;;  %v86_v28 = vld [vmem:[#allocation6 + $0x80] sm:$0xff]  ;;  %v88_v29 = vld [vmem:[#allocation6 + $0x90] sm:$0xff] }
  0x3e   :  { %v509_v27 = vpack.c.bf16 %v89_v25, %v87_v24  ;;  %v91_v30 = vld [vmem:[#allocation6 + $0xa8] sm:$0xff]  ;;  %v93_v31 = vld [vmem:[#allocation6 + $0xb8] sm:$0xff]  ;;  %v511_v32 = vpack.c.bf16 %v88_v29, %v86_v28  ;;  %v90_v34 = vld [vmem:[#allocation6 + $0xa0] sm:$0xff]  ;;  %p657_p0 = pnand %p656_p13, %p650_p10 }
  0x3f   :  { %500 = vmatpush1.bf16.msra.mxu0 %v499_v14  ;;  %v513_v33 = vpack.c.bf16 %v93_v31, %v91_v30  ;;  %v92_v35 = vld [vmem:[#allocation6 + $0xb0] sm:$0xff]  ;;  %v95_v36 = vld [vmem:[#allocation6 + $0xc8] sm:$0xff]  ;;  %v97_v37 = vld [vmem:[#allocation6 + $0xd8] sm:$0xff] }
  0x40   :  { %502 = vmatprep.subr.bf16.mxu0 %v501_v15  ;;  %v515_v38 = vpack.c.bf16 %v92_v35, %v90_v34  ;;  %v517_v39 = vpack.c.bf16 %v97_v37, %v95_v36  ;;  %v94_v40 = vld [vmem:[#allocation6 + $0xc0] sm:$0xff]  ;;  %v96_v41 = vld [vmem:[#allocation6 + $0xd0] sm:$0xff]  ;;  %v99_v42 = vld [vmem:[#allocation6 + $0xe8] sm:$0xff]  ;;  %v104_v35 = vlaneseq }
  0x41   :  { %v101_v43 = vld [vmem:[#allocation6 + $0xf8] sm:$0xff]  ;;  %v519_v44 = vpack.c.bf16 %v96_v41, %v94_v40  ;;  %v98_v46 = vld [vmem:[#allocation6 + $0xe0] sm:$0xff]  ;;  %v100_v47 = vld [vmem:[#allocation6 + $0xf0] sm:$0xff] }
  0x42   :  { %v521_v45 = vpack.c.bf16 %v101_v43, %v99_v42  ;;  %v523_v48 = vpack.c.bf16 %v100_v47, %v98_v46  ;;  %v68_v49 = vld [vmem:[#allocation3] sm:$0xff]  ;;  %v69_v50 = vld [vmem:[#allocation3 + $0x8] sm:$0xff]  ;;  %v325_v51 = vld [vmem:[#allocation8 + $0x80] sm:$0xff]  ;;  %v105_v36 = vshrl.u32 %v104_v35, 7 }
  0x43   :  { %504 = vmatpush1.bf16.msra.mxu0 %v503_v20  ;;  %v326_v52 = vld [vmem:[#allocation8 + $0x88] sm:$0xff]  ;;  %v309_v54 = vld [vmem:[#allocation8] sm:$0xff]  ;;  %v327_v57 = vld [vmem:[#allocation8 + $0x90] sm:$0xff] }
  0x44   :  { %506 = vmatprep.subr.bf16.mxu0 %v505_v21  ;;  %v525_v53 = vpack.c.bf16 %v326_v52, %v325_v51  ;;  %v310_v55 = vld [vmem:[#allocation8 + $0x8] sm:$0xff]  ;;  %v328_v58 = vld [vmem:[#allocation8 + $0x98] sm:$0xff]  ;;  %v311_v60 = vld [vmem:[#allocation8 + $0x10] sm:$0xff]  ;;  %v106_v37 = vsub.s32 0, %v105_v36 }
  0x45   :  { %v527_v56 = vpack.c.bf16 %v310_v55, %v309_v54  ;;  %v529_v59 = vpack.c.bf16 %v328_v58, %v327_v57  ;;  %v312_v61 = vld [vmem:[#allocation8 + $0x18] sm:$0xff]  ;;  %v329_v63 = vld [vmem:[#allocation8 + $0xa0] sm:$0xff]  ;;  %v314_v3 = vld [vmem:[#allocation8 + $0x28] sm:$0xff] }
  0x46   :  { %526 = vmatprep.subr.bf16.mxu1 %v525_v53  ;;  %v531_v62 = vpack.c.bf16 %v312_v61, %v311_v60  ;;  %v313_v1 = vld [vmem:[#allocation8 + $0x20] sm:$0xff]  ;;  %v331_v4 = vld [vmem:[#allocation8 + $0xb0] sm:$0xff]  ;;  %v332_v5 = vld [vmem:[#allocation8 + $0xb8] sm:$0xff] }
  0x47   :  { %508 = vmatpush1.bf16.msra.mxu0 %v507_v26  ;;  %528 = vmatpush3.bf16.msra.mxu1 %v527_v56  ;;  %v535_v6 = vpack.c.bf16 %v314_v3, %v313_v1  ;;  %v537_v7 = vpack.c.bf16 %v332_v5, %v331_v4  ;;  %v315_v8 = vld [vmem:[#allocation8 + $0x30] sm:$0xff]  ;;  %v316_v9 = vld [vmem:[#allocation8 + $0x38] sm:$0xff]  ;;  %v333_v10 = vld [vmem:[#allocation8 + $0xc0] sm:$0xff] }
  0x48   :  { %510 = vmatprep.subr.bf16.mxu0 %v509_v27  ;;  %530 = vmatprep.subr.bf16.mxu1 %v529_v59  ;;  %v334_v11 = vld [vmem:[#allocation8 + $0xc8] sm:$0xff]  ;;  %v539_v12 = vpack.c.bf16 %v316_v9, %v315_v8  ;;  %v317_v14 = vld [vmem:[#allocation8 + $0x40] sm:$0xff]  ;;  %v335_v16 = vld [vmem:[#allocation8 + $0xd0] sm:$0xff] }
  0x49   :  { %v541_v13 = vpack.c.bf16 %v334_v11, %v333_v10  ;;  %v318_v15 = vld [vmem:[#allocation8 + $0x48] sm:$0xff]  ;;  %v336_v17 = vld [vmem:[#allocation8 + $0xd8] sm:$0xff]  ;;  %v319_v20 = vld [vmem:[#allocation8 + $0x50] sm:$0xff] }
  0x4a   :  { %v543_v18 = vpack.c.bf16 %v318_v15, %v317_v14  ;;  %v545_v19 = vpack.c.bf16 %v336_v17, %v335_v16  ;;  %v320_v21 = vld [vmem:[#allocation8 + $0x58] sm:$0xff]  ;;  %v337_v22 = vld [vmem:[#allocation8 + $0xe0] sm:$0xff]  ;;  %v338_v23 = vld [vmem:[#allocation8 + $0xe8] sm:$0xff] }
  0x4b   :  { %512 = vmatpush1.bf16.msra.mxu0 %v511_v32  ;;  %532 = vmatpush3.bf16.msra.mxu1 %v531_v62  ;;  %v547_v24 = vpack.c.bf16 %v320_v21, %v319_v20  ;;  %v549_v25 = vpack.c.bf16 %v338_v23, %v337_v22  ;;  %v321_v26 = vld [vmem:[#allocation8 + $0x60] sm:$0xff]  ;;  %v322_v27 = vld [vmem:[#allocation8 + $0x68] sm:$0xff]  ;;  %v339_v28 = vld [vmem:[#allocation8 + $0xf0] sm:$0xff] }
  0x4c   :  { %514 = vmatprep.subr.bf16.mxu0 %v513_v33  ;;  %v340_v29 = vld [vmem:[#allocation8 + $0xf8] sm:$0xff]  ;;  %v551_v30 = vpack.c.bf16 %v322_v27, %v321_v26  ;;  %v323_v32 = vld [vmem:[#allocation8 + $0x70] sm:$0xff] }
  0x4d   :  { %v553_v31 = vpack.c.bf16 %v340_v29, %v339_v28  ;;  %v324_v33 = vld [vmem:[#allocation8 + $0x78] sm:$0xff] }
  0x4e   :  { %v555_v34 = vpack.c.bf16 %v324_v33, %v323_v32 }
  0x4f   :  { %516 = vmatpush1.bf16.msra.mxu0 %v515_v38  ;;  %v102_v38 = vld [vmem:[%s816_s2] sm:$0x3] }
  0x50   :  { %518 = vmatprep.subr.bf16.mxu0 %v517_v39  ;;  %v110_v39 = vsub.s32 1, %v105_v36  ;;  %v107_v40 = vrot.slane %v102_v38, %v106_v37 }
  0x52   :  { %v111_v41 = vrot.slane %v102_v38, %v110_v39 }
  0x53   :  { %520 = vmatpush1.bf16.msra.mxu0 %v519_v44 }
  0x54   :  { %522 = vmatprep.subr.bf16.mxu0 %v521_v45 }
  0x57   :  { %524 = vmatpush1.bf16.msra.mxu0 %v523_v48 }
  0x5a   :  { %179 = vmatmul.mubr.f32.vlgmr.msra.gmra.mrb[0].mxu0 %v68_v49 }
  0x5b   :  { %184 = vmatprep.mubr.f32.mxu0 %v684_v0  ;;  %v330_v0 = vld [vmem:[#allocation8 + $0xa8] sm:$0xff] }
  0x5c   :  { %v533_v2 = vpack.c.bf16 %v330_v0, %v329_v63 }
  0x5e   :  { %185 = vmatmul.mubr.f32.gmra.mrb[2].mxu0 %v69_v50  ;;  %534 = vmatprep.subr.bf16.mxu1 %v533_v2 }
  0x5f   :  { %536 = vmatpush3.bf16.msra.mxu1 %v535_v6 }
  0x60   :  { %538 = vmatprep.subr.bf16.mxu1 %v537_v7 }
  0x63   :  { %540 = vmatpush3.bf16.msra.mxu1 %v539_v12 }
  0x64   :  { %542 = vmatprep.subr.bf16.mxu1 %v541_v13 }
  0x67   :  { %544 = vmatpush3.bf16.msra.mxu1 %v543_v18 }
  0x68   :  { %546 = vmatprep.subr.bf16.mxu1 %v545_v19 }
  0x6b   :  { %548 = vmatpush3.bf16.msra.mxu1 %v547_v24 }
  0x6c   :  { %550 = vmatprep.subr.bf16.mxu1 %v549_v25 }
  0x6f   :  { %552 = vmatpush3.bf16.msra.mxu1 %v551_v30 }
  0x70   :  { %554 = vmatprep.subr.bf16.mxu1 %v553_v31 }
  0x73   :  { %556 = vmatpush3.bf16.msra.mxu1 %v555_v34 }
 0x12d   :  { %v180_v42 = vpop.f32.mrb[0].mxu0 }
 0x12e   :  { %v764_v43 = vadd.f32 %v180_v42, %v107_v40  ;;  %v182_v44 = vpop.f32.mrb[1].mxu0 }
 0x12f   :  { %v766_v45 = vadd.f32 %v182_v44, %v111_v41 }
 0x130   :  { %v769_v46 = vmul.f32 0.70710677, %v764_v43 }
 0x131   :  { %v772_v47 = vmul.f32 0.70710677, %v766_v45  ;;  %v186_v48 = vpop.f32.mrb[2].mxu0 }
 0x132   :  { %v207_v49 = vand.u32 2147483647, %v769_v46  ;;  %v775_v50 = vadd.f32 %v186_v48, %v107_v40  ;;  %v188_v51 = vpop.f32.mrb[3].mxu0  ;;  %vm199_vm0 = vcmp.ge.f32.partialorder %v769_v46, 0.0 }
 0x133   :  { %v208_v52 = vand.u32 2147483647, %v772_v47  ;;  %v778_v53 = vadd.f32 %v188_v51, %v111_v41  ;;  %vm200_vm1 = vcmp.ge.f32.partialorder %v772_v47, 0.0 }
 0x134   :  { %v211_v54 = vmul.f32 0.3275911, %v207_v49  ;;  %v781_v55 = vmul.f32 0.70710677, %v775_v50  ;;  %v271_v5 = vsub.f32 0.0, %v207_v49 }
 0x135   :  { %v212_v56 = vmul.f32 0.3275911, %v208_v52  ;;  %v784_v57 = vmul.f32 0.70710677, %v778_v53  ;;  %v272_v8 = vsub.f32 0.0, %v208_v52 }
 0x136   :  { %v215_v58 = vadd.f32 1.0, %v211_v54  ;;  %v209_v59 = vand.u32 2147483647, %v781_v55  ;;  %v275_v13 = vmul.f32 %v271_v5, %v207_v49  ;;  %vm201_vm2 = vcmp.ge.f32.partialorder %v781_v55, 0.0 }
 0x137   :  { %v216_v60 = vadd.f32 1.0, %v212_v56  ;;  %v210_v62 = vand.u32 2147483647, %v784_v57  ;;  %v276_v17 = vmul.f32 %v272_v8, %v208_v52  ;;  %vm202_vm3 = vcmp.ge.f32.partialorder %v784_v57, 0.0 }
 0x138   :  { %567 = vrcp.f32 %v215_v58  ;;  %v213_v61 = vmul.f32 0.3275911, %v209_v59  ;;  %v273_v15 = vsub.f32 0.0, %v209_v59  ;;  %v279_v25 = vmul.f32 1.442695, %v275_v13 }
 0x139   :  { %569 = vrcp.f32 %v216_v60  ;;  %v214_v0 = vmul.f32 0.3275911, %v210_v62  ;;  %v274_v23 = vsub.f32 0.0, %v210_v62  ;;  %v281_v29 = vmul.f32 1.442695, %v276_v17 }
 0x13a   :  { %v217_v63 = vadd.f32 1.0, %v213_v61  ;;  %v277_v26 = vmul.f32 %v273_v15, %v209_v59 }
 0x13b   :  { %v218_v1 = vadd.f32 1.0, %v214_v0  ;;  %v278_v34 = vmul.f32 %v274_v23, %v210_v62 }
 0x13c   :  { %571 = vrcp.f32 %v217_v63  ;;  %v283_v37 = vmul.f32 1.442695, %v277_v26 }
 0x13d   :  { %573 = vrcp.f32 %v218_v1  ;;  %v285_v48 = vmul.f32 1.442695, %v278_v34 }
 0x13e   :  { %575 = vpow2.f32 %v279_v25 }
 0x13f   :  { %577 = vpow2.f32 %v281_v29 }
 0x140   :  { %579 = vpow2.f32 %v283_v37 }
 0x141   :  { %581 = vpow2.f32 %v285_v48 }
 0x142   :  { %v568_v2 = vpop.eup %567 }
 0x143   :  { %v570_v3 = vpop.eup %569  ;;  %v223_v4 = vmul.f32 %v568_v2, %v215_v58 }
 0x144   :  { %v224_v6 = vmul.f32 %v570_v3, %v216_v60 }
 0x145   :  { %v227_v7 = vsub.f32 2.0, %v223_v4 }
 0x146   :  { %v572_v9 = vpop.eup %571  ;;  %v228_v10 = vsub.f32 2.0, %v224_v6 }
 0x147   :  { %v231_v11 = vmul.f32 %v568_v2, %v227_v7  ;;  %v225_v12 = vmul.f32 %v572_v9, %v217_v63  ;;  %v574_v16 = vpop.eup %573 }
 0x148   :  { %v232_v14 = vmul.f32 %v570_v3, %v228_v10  ;;  %v226_v20 = vmul.f32 %v574_v16, %v218_v1  ;;  %v576_v3 = vpop.eup %575 }
 0x149   :  { %v229_v18 = vsub.f32 2.0, %v225_v12  ;;  %v235_v19 = vmul.f32 1.0614054, %v231_v11  ;;  %v578_v6 = vpop.eup %577 }
 0x14a   :  { %v236_v21 = vmul.f32 1.0614054, %v232_v14  ;;  %v230_v27 = vsub.f32 2.0, %v226_v20  ;;  %v580_v15 = vpop.eup %579 }
 0x14b   :  { %v233_v22 = vmul.f32 %v572_v9, %v229_v18  ;;  %v239_v24 = vadd.f32 -1.4531521, %v235_v19  ;;  %v582_v23 = vpop.eup %581 }
 0x14c   :  { %v240_v28 = vadd.f32 -1.4531521, %v236_v21  ;;  %v234_v32 = vmul.f32 %v574_v16, %v230_v27  ;;  %v685_v16 = vmov -1.0  }
 0x14d   :  { %v243_v30 = vmul.f32 %v239_v24, %v231_v11  ;;  %v237_v31 = vmul.f32 1.0614054, %v233_v22  ;;  %v203_v17 = vsel %vm199_vm0, 1.0, %v685_v16  ;;  %v192_v24 = vmul.f32 0.5, %v766_v45 }
 0x14e   :  { %v244_v33 = vmul.f32 %v240_v28, %v232_v14  ;;  %v238_v39 = vmul.f32 1.0614054, %v234_v32  ;;  %v205_v26 = vsel %vm201_vm2, 1.0, %v685_v16  ;;  %v191_v28 = vmul.f32 0.5, %v764_v43 }
 0x14f   :  { %v247_v35 = vadd.f32 1.4214138, %v243_v30  ;;  %v241_v36 = vadd.f32 -1.4531521, %v237_v31  ;;  %v206_v31 = vsel %vm202_vm3, 1.0, %v685_v16  ;;  %v194_v45 = vmul.f32 0.5, %v778_v53 }
 0x150   :  { %v248_v38 = vadd.f32 1.4214138, %v244_v33  ;;  %v242_v44 = vadd.f32 -1.4531521, %v238_v39  ;;  %v454_v39 = vld [vmem:[%s818_s4] ss:$0 sm:$0xff] }
 0x151   :  { %v251_v40 = vmul.f32 %v247_v35, %v231_v11  ;;  %v245_v41 = vmul.f32 %v241_v36, %v233_v22  ;;  %v193_v36 = vmul.f32 0.5, %v775_v50 }
 0x152   :  { %v252_v42 = vmul.f32 %v248_v38, %v232_v14  ;;  %v246_v54 = vmul.f32 %v242_v44, %v234_v32 }
 0x153   :  { %v255_v49 = vadd.f32 -0.28449672, %v251_v40  ;;  %v249_v51 = vadd.f32 1.4214138, %v245_v41 }
 0x154   :  { %v256_v52 = vadd.f32 -0.28449672, %v252_v42  ;;  %v250_v60 = vadd.f32 1.4214138, %v246_v54 }
 0x155   :  { %v259_v56 = vmul.f32 %v255_v49, %v231_v11  ;;  %v253_v58 = vmul.f32 %v249_v51, %v233_v22 }
 0x156   :  { %v260_v59 = vmul.f32 %v256_v52, %v232_v14  ;;  %v254_v0 = vmul.f32 %v250_v60, %v234_v32 }
 0x157   :  { %v263_v61 = vadd.f32 0.2548296, %v259_v56  ;;  %v257_v62 = vadd.f32 -0.28449672, %v253_v58 }
 0x158   :  { %v264_v63 = vadd.f32 0.2548296, %v260_v59  ;;  %v258_v5 = vadd.f32 -0.28449672, %v254_v0 }
 0x159   :  { %v267_v1 = vmul.f32 %v263_v61, %v231_v11  ;;  %v261_v2 = vmul.f32 %v257_v62, %v233_v22 }
 0x15a   :  { %v268_v4 = vmul.f32 %v264_v63, %v232_v14  ;;  %v262_v10 = vmul.f32 %v258_v5, %v234_v32  ;;  %v204_v14 = vsel %vm200_vm1, 1.0, %v685_v16 }
 0x15b   :  { %v287_v7 = vmul.f32 %v576_v3, %v267_v1  ;;  %v265_v8 = vadd.f32 0.2548296, %v261_v2 }
 0x15c   :  { %v288_v9 = vmul.f32 %v578_v6, %v268_v4  ;;  %v266_v11 = vadd.f32 0.2548296, %v262_v10 }
 0x15d   :  { %v291_v12 = vsub.f32 1.0, %v287_v7  ;;  %v269_v13 = vmul.f32 %v265_v8, %v233_v22 }
 0x15e   :  { %v292_v18 = vsub.f32 1.0, %v288_v9  ;;  %v270_v46 = vmul.f32 %v266_v11, %v234_v32 }
 0x15f   :  { %v295_v19 = vmul.f32 %v291_v12, %v203_v17  ;;  %v289_v20 = vmul.f32 %v580_v15, %v269_v13 }
 0x160   :  { %v296_v21 = vmul.f32 %v292_v18, %v204_v14  ;;  %v290_v27 = vmul.f32 %v582_v23, %v270_v46 }
 0x161   :  { %v299_v47 = vadd.f32 1.0, %v295_v19  ;;  %v293_v25 = vsub.f32 1.0, %v289_v20 }
 0x162   :  { %v300_v22 = vadd.f32 1.0, %v296_v21  ;;  %v294_v55 = vsub.f32 1.0, %v290_v27 }
 0x163   :  { %v297_v29 = vmul.f32 %v293_v25, %v205_v26  ;;  %v303_v33 = vmul.f32 %v299_v47, %v191_v28 }
 0x164   :  { %v304_v30 = vmul.f32 %v300_v22, %v192_v24  ;;  %v298_v34 = vmul.f32 %v294_v55, %v206_v31 }
 0x165   :  { %v301_v32 = vadd.f32 1.0, %v297_v29 }
 0x166   :  { %405 = vmatprep.mubr.f32.mxu1 %v304_v30  ;;  %v302_v35 = vadd.f32 1.0, %v298_v34 }
 0x167   :  { %406 = vmatmul.mubr.f32.vlgmr.msra.gmra.mrb[0].mxu1 %v303_v33  ;;  %v305_v57 = vmul.f32 %v301_v32, %v193_v36 }
 0x168   :  { %v306_v37 = vmul.f32 %v302_v35, %v194_v45 }
 0x16a   :  { %410 = vmatprep.mubr.f32.mxu1 %v306_v37 }
 0x16b   :  { %411 = vmatmul.mubr.f32.gmra.mrb[2].mxu1 %v305_v57 }
 0x23a   :  { %v487_v38 = vpop.f32.mrb[0].mxu1 }
 0x23b   :  { %v488_v43 = vpop.f32.mrb[1].mxu1 }
 0x23c   :  { %v489_v40 = vadd.f32 %v488_v43, %v487_v38 }
 0x23e   :  { %v432_v41 = vadd.f32 %v489_v40, %v454_v39  ;;  %v490_v42 = vpop.f32.mrb[2].mxu1 }
 0x23f   :  { %v491_v44 = vpop.f32.mrb[3].mxu1 }
 0x240   :  { %434 = vst [vmem:[#allocation9] sm:$0xff] %v432_v41  ;;  %v492_v53 = vadd.f32 %v491_v44, %v490_v42 }
 0x242   :  { %v433_v48 = vadd.f32 %v492_v53, %v454_v39 }
 0x244   :  { %435 = vst [vmem:[#allocation9 + $0x8] sm:$0xff] %v433_v48 }
 0x245   :  { %660 = shalt.err (!%p657_p0)
}
 0x246   :  { %s661_s12 = scalar_lea.hbm %s819_s5, 256 }
 0x247   :  { %p662_p1 = scmp.ne.s32.totalorder %s819_s5, %s661_s12  ;;  %p665_p2 = scmp.lt.u32.totalorder %s661_s12, %s819_s5 }
 0x249   :  { %p667_p3 = pnand %p665_p2, %p662_p1 }
 0x24b   :  { %670 = shalt.err (!%p667_p3)
}
 0x24c   :  { %447 = dma.vmem_to_hbm [thread:$0]  %s442_s9, 256, %s819_s5, [#allocation5], %s681_s1, %s681_s1, %s682_s17  }
 0x24d   :  { %675 = dma.done.wait [#allocation5], 256  }
 0x24e   :  { %676 = vsyncadd [#allocation5], 4294967040 }
 0x24f   :  { %451 = vsyncpa [#allocation4], 1 }
 0x250   :  { %452 = vsyncpa [#allocation7], 1 }
 0x251   :  { %453 = vsyncpa [#allocation5], 1 }

</bundles_post_ra>
